<compile_context>
chip_gen: v7x
topology: tpu7x:2x2x1
jax: 0.10.0
libtpu: 0.0.40
codegen_flags: <defaults>
</compile_context>

<pallas_src>
import jax
import jax.numpy as jnp
from jax.experimental import pallas as pl
from jax.experimental.pallas import tpu as pltpu


HID = 10  # hidden width of the first Linear (fixed by the module spec)


def _generator_kernel(x_ref, w1_ref, b1_ref, w2_ref, o_ref):
    # x_ref : (ROWS, D)     ROWS = b_tile * N, pre-flattened in the wrapper.
    # w1_ref: (D, HID)      first Linear weight, (in, out) layout, same dtype as x.
    # b1_ref: (1, HID) f32
    # w2_ref: (1, HID) f32  second Linear weight as a row (its bias is a softmax no-op).
    # o_ref : (b_tile, N) f32  lane-dense softmax output (candidates N on the lane axis).
    bt, n = o_ref.shape

    # Linear(D -> HID) + ReLU on all ROWS in a single MXU pass (f32 accumulation).
    h = jnp.dot(x_ref[...], w1_ref[...], preferred_element_type=jnp.float32)
    h = jnp.maximum(h + b1_ref[...], 0.0)                        # (ROWS, HID) f32

    # Linear(HID -> 1) on the VPU/XLU: broadcast multiply + small lane reduce.
    logits = jnp.sum(h * w2_ref[...], axis=-1, keepdims=True)    # (ROWS, 1)
    logits = logits.reshape(bt, n)                               # tiny (bt*n values) relayout

    # Softmax over the candidate axis N (== PyTorch Softmax(dim=1) for a (B, N, 1) input).
    m = jnp.max(logits, axis=-1, keepdims=True)                  # (bt, 1)
    e = jnp.exp(logits - m)                                      # (bt, n)
    denom = jnp.sum(e, axis=-1, keepdims=True)                   # (bt, 1)
    # Exact normalization (rows sum to 1 to f32 rounding); approx reciprocal was not
    # accurate enough for downstream sum-to-one checks.
    o_ref[...] = e / denom


def _round_up(v, m):
    return -(-v // m) * m


def _vmem_cap_bytes():
    """Physical VMEM per TensorCore; conservative 64 MiB (v7x) fallback."""
    try:
        info = pltpu.get_tpu_info()
        cap = int(getattr(info, "vmem_capacity_bytes", 0))
        if cap > 0:
            return cap
    except Exception:
        pass
    return 64 << 20


def _choose_b_tile(B, N, D, x_itemsize, vmem_cap):
    """Batch elements per grid step, sized in padded-VMEM bytes (not raw bytes)."""
    d_pad = _round_up(D, 128)
    # Per-batch-element VMEM footprint (lane/sublane-padded layout):
    x_per_b = N * d_pad * x_itemsize           # one x buffer
    h_per_b = N * 128 * 4                      # HID=10 pads to 128 lanes, f32
    out_per_b = _round_up(N, 128) * 4          # output tile lane padding
    # 2x x (double buffered), 2x h (h + reduce/softmax intermediates), 2x out.
    per_b = 2 * x_per_b + 2 * h_per_b + 2 * out_per_b
    budget = int(vmem_cap * 0.6)               # headroom for weights / compiler scratch
    bt_fit = max(1, budget // max(1, per_b))
    # Byte target: ~8 MiB of padded x per buffer amortizes the ~0.35us per-step overhead.
    bt_target = max(1, (8 << 20) // max(1, x_per_b))
    bt = int(min(bt_fit, bt_target, B))
    if B >= 2:
        bt = min(bt, -(-B // 2))               # >= 2 grid steps -> both TCs usable on v7x
    return max(1, bt)


def _largest_divisor_le(B, bt):
    """Largest divisor of B that is <= bt (lets us avoid the wrapper-side jnp.pad)."""
    best, d = 1, 1
    while d * d <= B:
        if B % d == 0:
            if d <= bt:
                best = max(best, d)
            if (B // d) <= bt:
                best = max(best, B // d)
        d += 1
    return best


def generator_forward(x, w1, b1, w2, b2=None, *, b_tile=None):
    """x: (B, N, D), float32 or bfloat16.  Weights in (in, out) layout: w1 (D,10),
    b1 (1,10), w2 (10,1).  b2 accepted for API parity but unused (softmax is
    shift-invariant).  Returns (B, N, 1) float32 softmax over the candidate axis."""
    B, N, D = x.shape
    x = jnp.asarray(x)
    if x.dtype != jnp.bfloat16:
        x = x.astype(jnp.float32)              # bf16 stays bf16 (halves HBM traffic)
    itemsize = x.dtype.itemsize
    w1 = jnp.asarray(w1, x.dtype).reshape(D, HID)       # match MXU input dtype (tiny)
    b1 = jnp.asarray(b1, jnp.float32).reshape(1, HID)
    w2_row = jnp.asarray(w2, jnp.float32).reshape(1, HID)
    del b2  # no-op under softmax; dropping it saves a padded (8,128) VMEM tile + DMA

    vmem_cap = _vmem_cap_bytes()
    if b_tile is None:
        bt_target = _choose_b_tile(B, N, D, itemsize, vmem_cap)
        div = _largest_divisor_le(B, bt_target)
        # Prefer a divisor (no pad); only pad if divisors fall far below the byte target.
        b_tile = div if div * 4 >= bt_target else bt_target
    b_tile = int(min(max(int(b_tile), 1), B))

    num_tiles = -(-B // b_tile)
    B_pad = num_tiles * b_tile
    if B_pad != B:
        # Fallback only: padded rows produce a uniform softmax and are sliced away below.
        x = jnp.pad(x, ((0, B_pad - B), (0, 0), (0, 0)))

    rows = b_tile * N
    # Free HBM reshape: the kernel sees flat (rows, D) blocks, no in-kernel merge relayout.
    x_flat = x.reshape(num_tiles, rows, D)

    # Padding-aware VMEM budget (lane dims -> 128, sublane dims -> 8).
    d_pad = _round_up(D, 128)
    x_tile_vmem = _round_up(rows, 8) * d_pad * itemsize
    h_vmem = _round_up(rows, 8) * 128 * 4
    out_tile_vmem = _round_up(b_tile, 8) * _round_up(N, 128) * 4
    w_vmem = _round_up(D, 8) * 128 * itemsize + 2 * 8 * 128 * 4
    vmem_needed = (2 * x_tile_vmem            # double-buffered input tiles
                   + 2 * h_vmem               # h + reduce/softmax intermediates
                   + 2 * out_tile_vmem        # double-buffered output tiles
                   + 2 * w_vmem
                   + (4 << 20))               # slack for compiler scratch
    vmem_limit = int(min(max(vmem_needed, 16 << 20), int(vmem_cap * 0.75)))

    out = pl.pallas_call(
        _generator_kernel,
        out_shape=jax.ShapeDtypeStruct((num_tiles, b_tile, N), jnp.float32),
        grid=(num_tiles,),
        in_specs=[
            pl.BlockSpec((None, rows, D), lambda t: (t, 0, 0)),
            pl.BlockSpec((D, HID), lambda t: (0, 0)),
            pl.BlockSpec((1, HID), lambda t: (0, 0)),
            pl.BlockSpec((1, HID), lambda t: (0, 0)),
        ],
        out_specs=pl.BlockSpec((None, b_tile, N), lambda t: (t, 0, 0)),
        compiler_params=pltpu.CompilerParams(
            dimension_semantics=("parallel",),   # batch-tile axis -> megacore shardable
            vmem_limit_bytes=vmem_limit,
        ),
    )(x_flat, w1, b1, w2_row)

    out = out.reshape(B_pad, N, 1)
    if B_pad != B:
        out = out[:B]
    return out


def init_generator_params(key, hrt_concat_dim):
    """Deterministic init mimicking PyTorch nn.Linear default (uniform +-1/sqrt(fan_in)).
    Weights kept in (in, out) layout for the kernel."""
    k1, k2, k3, k4 = jax.random.split(key, 4)
    bound1 = 1.0 / jnp.sqrt(hrt_concat_dim)
    bound2 = 1.0 / jnp.sqrt(HID)
    w1 = jax.random.uniform(k1, (hrt_concat_dim, HID), jnp.float32, -bound1, bound1)
    b1 = jax.random.uniform(k2, (1, HID), jnp.float32, -bound1, bound1)
    w2 = jax.random.uniform(k3, (HID, 1), jnp.float32, -bound2, bound2)
    b2 = jax.random.uniform(k4, (1, 1), jnp.float32, -bound2, bound2)
    return w1, b1, w2, b2


def generator_ref(x, w1, b1, w2, b2):
    """Pure-JAX reference (keeps b2, which cancels in the softmax)."""
    h = jnp.maximum(jnp.einsum("bnd,dh->bnh", x, w1) + b1[None], 0.0)
    logits = jnp.einsum("bnh,ho->bno", h, w2) + b2[None]
    return jax.nn.softmax(logits, axis=1)


if __name__ == "__main__":
    key = jax.random.PRNGKey(0)
    kx, kp = jax.random.split(key)

    B, N, D = 4, 8, 32            # batch, candidates, hrt_concat_dim
    x = jax.random.normal(kx, (B, N, D), dtype=jnp.float32)
    w1, b1, w2, b2 = init_generator_params(kp, D)
    ref = generator_ref(x, w1, b1, w2, b2)

    # Explicit small tile -> 2 grid steps, exercising the batch-tiled path.
    out = jax.block_until_ready(generator_forward(x, w1, b1, w2, b2, b_tile=2))
    assert out.shape == (B, N, 1)
    assert jnp.allclose(out, ref, atol=1e-3, rtol=1e-3), "mismatch vs reference"
    assert jnp.allclose(jnp.sum(out, axis=1), 1.0, atol=1e-3), "softmax rows must sum to 1"

    # Auto-chosen tile (divisor of B, no padding).
    out2 = jax.block_until_ready(generator_forward(x, w1, b1, w2, b2))
    assert jnp.allclose(out2, ref, atol=1e-3, rtol=1e-3), "mismatch vs reference (auto tile)"
    assert jnp.allclose(jnp.sum(out2, axis=1), 1.0, atol=1e-3)

    # bf16 input path: no forced f32 upcast, MXU takes bf16 with f32 accumulation.
    out_bf = jax.block_until_ready(generator_forward(x.astype(jnp.bfloat16), w1, b1, w2, b2))
    assert out_bf.shape == (B, N, 1)
    assert jnp.allclose(out_bf, ref, atol=3e-2, rtol=3e-2), "mismatch vs reference (bf16 x)"
    assert jnp.allclose(jnp.sum(out_bf, axis=1), 1.0, atol=1e-3)

    print("KERNEL_OK")
</pallas_src>

<mosaic_0001>
module attributes {stable_mosaic.version = 11 : i64} {
  func.func @_generator_kernel(%arg0: i32, %arg1: memref<1x16x32xf32, #tpu.memory_space<vmem>>, %arg2: memref<32x10xf32, #tpu.memory_space<vmem>>, %arg3: memref<1x10xf32, #tpu.memory_space<vmem>>, %arg4: memref<1x10xf32, #tpu.memory_space<vmem>>, %arg5: memref<1x2x8xf32, #tpu.memory_space<vmem>>) attributes {dimension_semantics = [#tpu.dimension_semantics<parallel>], iteration_bounds = array<i64: 2>, scalar_prefetch = 0 : i64, scratch_operands = 0 : i64, tpu.core_type = #tpu.core_type<tc>, window_params = [{transform_indices = @transform_0, window_bounds = array<i64: 1, 16, 32>}, {pipeline_mode = #tpu.pipeline_mode<synchronous>, transform_indices = @transform_1, window_bounds = array<i64: 32, 10>}, {pipeline_mode = #tpu.pipeline_mode<synchronous>, transform_indices = @transform_2, window_bounds = array<i64: 1, 10>}, {pipeline_mode = #tpu.pipeline_mode<synchronous>, transform_indices = @transform_3, window_bounds = array<i64: 1, 10>}, {transform_indices = @transform_4, window_bounds = array<i64: 1, 2, 8>}]} {
    %c0 = arith.constant 0 : index
    %c0_0 = arith.constant 0 : index
    %c0_1 = arith.constant 0 : index
    %0 = vector.load %arg1[%c0, %c0_0, %c0_1] : memref<1x16x32xf32, #tpu.memory_space<vmem>>, vector<1x16x32xf32>
    %1 = vector.shape_cast %0 : vector<1x16x32xf32> to vector<16x32xf32>
    %c0_2 = arith.constant 0 : index
    %c0_3 = arith.constant 0 : index
    %2 = vector.load %arg2[%c0_2, %c0_3] : memref<32x10xf32, #tpu.memory_space<vmem>>, vector<32x10xf32>
    %cst = arith.constant dense<0.000000e+00> : vector<16x10xf32>
    %3 = tpu.matmul %1, %2, %cst {dimension_numbers = #tpu.dot_dimension_numbers<[1], [0], [0], [1], [0, 0, 1, 1], [], []>} : vector<16x32xf32>, vector<32x10xf32>, vector<16x10xf32> -> vector<16x10xf32>
    %c0_4 = arith.constant 0 : index
    %c0_5 = arith.constant 0 : index
    %4 = vector.load %arg3[%c0_4, %c0_5] : memref<1x10xf32, #tpu.memory_space<vmem>>, vector<1x10xf32>
    %5 = vector.broadcast %4 : vector<1x10xf32> to vector<16x10xf32>
    %6 = arith.addf %3, %5 : vector<16x10xf32>
    %cst_6 = arith.constant 0.000000e+00 : f32
    %7 = vector.broadcast %cst_6 : f32 to vector<16x10xf32>
    %8 = arith.maximumf %6, %7 : vector<16x10xf32>
    %c0_7 = arith.constant 0 : index
    %c0_8 = arith.constant 0 : index
    %9 = vector.load %arg4[%c0_7, %c0_8] : memref<1x10xf32, #tpu.memory_space<vmem>>, vector<1x10xf32>
    %10 = vector.broadcast %9 : vector<1x10xf32> to vector<16x10xf32>
    %11 = arith.mulf %8, %10 : vector<16x10xf32>
    %cst_9 = arith.constant dense<0.000000e+00> : vector<16xf32>
    %12 = vector.multi_reduction <add>, %11, %cst_9 [1] : vector<16x10xf32> to vector<16xf32>
    %13 = vector.shape_cast %12 : vector<16xf32> to vector<16x1xf32>
    %14 = vector.shape_cast %13 : vector<16x1xf32> to vector<2x8xf32>
    %cst_10 = arith.constant dense<0xFF800000> : vector<2xf32>
    %15 = vector.multi_reduction <maximumf>, %14, %cst_10 [1] : vector<2x8xf32> to vector<2xf32>
    %16 = vector.shape_cast %15 : vector<2xf32> to vector<2x1xf32>
    %17 = vector.broadcast %16 : vector<2x1xf32> to vector<2x8xf32>
    %18 = arith.subf %14, %17 : vector<2x8xf32>
    %19 = math.exp %18 : vector<2x8xf32>
    %cst_11 = arith.constant dense<0.000000e+00> : vector<2xf32>
    %20 = vector.multi_reduction <add>, %19, %cst_11 [1] : vector<2x8xf32> to vector<2xf32>
    %21 = vector.shape_cast %20 : vector<2xf32> to vector<2x1xf32>
    %22 = vector.broadcast %21 : vector<2x1xf32> to vector<2x8xf32>
    %23 = arith.divf %19, %22 : vector<2x8xf32>
    %c0_12 = arith.constant 0 : index
    %c0_13 = arith.constant 0 : index
    %c0_14 = arith.constant 0 : index
    %24 = vector.load %arg5[%c0_12, %c0_13, %c0_14] : memref<1x2x8xf32, #tpu.memory_space<vmem>>, vector<1x2x8xf32>
    %25 = vector.shape_cast %24 : vector<1x2x8xf32> to vector<2x8xf32>
    %26 = vector.shape_cast %23 : vector<2x8xf32> to vector<1x2x8xf32>
    tpu.vector_store %arg5[%c0_12, %c0_13, %c0_14], %26 {strides = array<i32>} : memref<1x2x8xf32, #tpu.memory_space<vmem>>, vector<1x2x8xf32>,
    return
  }
  func.func @transform_0(%arg0: i32) -> (i32, i32, i32) {
    %c0_i32 = arith.constant 0 : i32
    %c0_i32_0 = arith.constant 0 : i32
    %c0_i32_1 = arith.constant 0 : i32
    return %arg0, %c0_i32, %c0_i32_0 : i32, i32, i32
  }
  func.func @transform_1(%arg0: i32) -> (i32, i32) {
    %c0_i32 = arith.constant 0 : i32
    %c0_i32_0 = arith.constant 0 : i32
    %c0_i32_1 = arith.constant 0 : i32
    return %c0_i32, %c0_i32_0 : i32, i32
  }
  func.func @transform_2(%arg0: i32) -> (i32, i32) {
    %c0_i32 = arith.constant 0 : i32
    %c0_i32_0 = arith.constant 0 : i32
    %c0_i32_1 = arith.constant 0 : i32
    return %c0_i32, %c0_i32_0 : i32, i32
  }
  func.func @transform_3(%arg0: i32) -> (i32, i32) {
    %c0_i32 = arith.constant 0 : i32
    %c0_i32_0 = arith.constant 0 : i32
    %c0_i32_1 = arith.constant 0 : i32
    return %c0_i32, %c0_i32_0 : i32, i32
  }
  func.func @transform_4(%arg0: i32) -> (i32, i32, i32) {
    %c0_i32 = arith.constant 0 : i32
    %c0_i32_0 = arith.constant 0 : i32
    %c0_i32_1 = arith.constant 0 : i32
    return %arg0, %c0_i32, %c0_i32_0 : i32, i32, i32
  }
}

</mosaic_0001>

<bundles_post_ra>
// kernel: tpu_custom_call.1
= control target key start
LH: loop header
LB: loop body
LE: loop exit
PB: predicated region body
PF: predicated region fallthrough
CT: control target
= control target key end

     0   :  { %9 = vsyncpa [#allocation3], 0  ;;  %s779_s0 = inlined_call_operand.vmem [shape: f32[2,16,32], index: 0, kind: input, shape index: {}]   ;;  %s780_s1 = inlined_call_operand.vmem [shape: f32[32,10], index: 1, kind: input, shape index: {}]   ;;  %s781_s2 = inlined_call_operand.vmem [shape: f32[1,10], index: 2, kind: input, shape index: {}]   ;;  %s782_s3 = inlined_call_operand.vmem [shape: f32[1,10], index: 3, kind: input, shape index: {}]   ;;  %s783_s4 = inlined_call_operand.hbm [shape: f32[2,2,8], index: 4, kind: output, shape index: {}]  }
   0x1   :  { %11 = vsyncpa [#allocation3 + $0x1], 0  ;;  %s655_s15 = smov 0   ;;  %s657_s16 = smov 0  }
   0x2   :  { %s659_s17 = smov 0   ;;  %s661_s18 = smov 0  }
   0x3 LB: > { %s676_s19 = sadd.s32 4294967295, %s626_s18   ;;  %s473_s20 = sadd.s32 4294967294, %s626_s18   ;;  %s626_s18 = sphi %s661_s18, %s789_s18   ;;  %s622_s17 = sphi %s659_s17, %s788_s17   ;;  %s618_s16 = sphi %s657_s16, %s787_s16   ;;  %s614_s15 = sphi %s655_s15, %s786_s15  }
   0x4   : > { %s680_s21 = sadd.s32 1, %s626_s18   ;;  %s113_s22 = sadd.s32 1, %s622_s17 }
   0x5   : > { %s110_s23 = ssub.s32 %s626_s18, %s680_s21  ;;  %p123_p0 = scmp.ne.s32.totalorder %s622_s17, %s618_s16 }
   0x6   : > { %p111_p1 = scmp.eq.s32.totalorder %s110_s23, 0  ;;  %p124_p2 = scmp.eq.s32.totalorder %s676_s19, 1 }
   0x7   : > { %p129_p3 = scmp.ne.s32.totalorder %s618_s16, %s614_s15  ;;  %p130_p4 = scmp.eq.s32.totalorder %s473_s20, 1 }
   0x8   : > { %s691_s24 = scalar_select %p111_p1, %s622_s17, %s113_s22  }
   0x9   : > { %p693_p5 = por %p124_p2, %p123_p0  ;;  %p697_p6 = por %p130_p4, %p129_p3 }
   0xa   : > { %p476_p7 = scmp.ge.s32.totalorder %s626_s18, 1  ;;  %p165_p8 = scmp.lt.s32.totalorder %s626_s18, 3 }
   0xc   : > { %p166_p9 = pnand %p476_p7, %p165_p8 }
   0xd   : > { %v198_v0 = vld [vmem:[%s780_s1] sm:$0xff] (!%p166_p9)  ;;  %v199_v1 = vld [vmem:[%s780_s1 + $0x8] sm:$0xff] (!%p166_p9)  ;;  %v200_v2 = vld [vmem:[%s780_s1 + $0x10] sm:$0xff] (!%p166_p9)  ;;  %p191_p10 = scmp.lt.s32.totalorder (!%p166_p9), %s676_s19, 1  ;;  %vm209_vm0 = vcmask (!%p166_p9), 261120   ;;  %vm302_vm1 = vcmask (!%p166_p9), 80896   ;;  %v311_v20 = vlaneseq (!%p166_p9) }
   0xe   : > { %169 = sbr.rel (%p166_p9) target bundleno = 995 (0x3e3), region = 36  ;;  %v506_v3 = vpack.c.bf16 (!%p166_p9), %v199_v1, %v198_v0  ;;  %v201_v4 = vld [vmem:[%s780_s1 + $0x18] sm:$0xff] (!%p166_p9)  ;;  %v480_v8 = vld [vmem:[%s781_s2] ss:$0 sm:$0xff] (!%p166_p9)  ;;  %vm321_vm2 = vcmask (!%p166_p9), 1041409   ;;  %vm324_vm3 = vcmask (!%p166_p9), 58368  }
   0xf   : > { %v510_v5 = vpack.c.bf16 (!%p166_p9), %v201_v4, %v200_v2  ;;  %v483_v13 = vld [vmem:[%s782_s3] ss:$0 sm:$0xff] (!%p166_p9)  ;;  %v312_v21 = vand.u32 (!%p166_p9), 127, %v311_v20  ;;  %v314_v22 = vshrl.u32 (!%p166_p9), %v311_v20, 7  ;;  %v628_v30 = vmov (!%p166_p9), 0   ;;  %s188_s27 = sand.u32 (!%p166_p9), 1, %s618_s16  }
  0x10   : > { %507 = vmatprep.subr.bf16.mxu0 (!%p166_p9), %v506_v3  ;;  %555 = vset.pattern.permute.xlu0 (!%p166_p9), %v628_v30  ;;  %s477_s28 = sshll.u32 (!%p166_p9), %s188_s27, 1  ;;  %s485_s29 = sshll.u32 (!%p166_p9), %s676_s19, 5 }
  0x11   : > { %509 = vmatpush3.bf16.msra.mxu0 (!%p166_p9), %v506_v3  ;;  %v315_v24 = vsub.s32 (!%p166_p9), %v312_v21, %v314_v22  ;;  %554 = vset.pattern.permute.xlu1 (!%p166_p9), %v628_v30  ;;  %v331_v31 = vsub.s32 (!%p166_p9), 0, %v314_v22  ;;  %v335_v32 = vsub.s32 (!%p166_p9), 1, %v314_v22  ;;  %s190_s30 = scalar_lea.vmem (!%p166_p9), [#allocation2], %s477_s28  ;;  %s735_s8 = scalar_lea.hbm (!%p166_p9), %s783_s4, %s485_s29 }
  0x12   : > { %511 = vmatprep.subr.bf16.mxu0 (!%p166_p9), %v510_v5  ;;  %s414_s5 = sshll.u32 (!%p166_p9), %s190_s30, 4  ;;  %s737_s5 = int_to_ptr.vmem [resolvable:$true] %s414_s5 }
  0x15   : > { %s192_s9 = scalar_select %p191_p10, %s676_s19, 1  ;;  %513 = vmatpush3.bf16.msra.mxu0 %v510_v5 }
  0x16   : > { %s401_s19 = scalar_lea.sflag [#allocation3], %s188_s27 }
  0x17   : > { %s488_s10 = sshll.u32 %s192_s9, 4  ;;  %s564_s9 = scalar_lea.vmem %s737_s5, 32 }
  0x18   : > { %s195_s13 = scalar_lea.vmem %s779_s0, %s488_s10  ;;  %p565_p11 = scmp.ne.s32.totalorder %s737_s5, %s564_s9 }
  0x19   : > { %v196_v6 = vld [vmem:[%s195_s13] sm:$0xff]  ;;  %v197_v7 = vld [vmem:[%s195_s13 + $0x8] sm:$0xff]  ;;  %s629_s10 = smov [#allocation2]  }
  0x1a   : > { %503 = vmatprep.mubr.msk.f32.mxu0 %vm209_vm0, %v196_v6  ;;  %p566_p12 = pnand %p565_p11, %p693_p5  ;;  %s568_s11 = sshll.u32 %s629_s10, 4  ;;  %s569_s11 = int_to_ptr.vmem [resolvable:$false] %s568_s11 }
  0x1b   : > { %504 = vmatmul.mubr.msk.f32.vlgmr.msra.gmra.mrb[0].mxu0 %vm209_vm0, %v197_v7  ;;  %s570_s12 = scalar_lea.vmem %s569_s11, 64  ;;  %p571_p0 = scmp.lt.s32.totalorder %s737_s5, %s569_s11 }
  0x1c   : > { %p567_p13 = pneg %p566_p12  ;;  %p572_p1 = scmp.lt.s32.totalorder %s570_s12, %s564_s9 }
  0x1e   : > { %p573_p2 = por %p572_p1, %p571_p0 }
  0x20   : > { %p574_p3 = pnand %p573_p2, %p567_p13 }
  0xee   : > { %v505_v9 = vpop.f32.mrb[0].mxu0 }
  0xef   : > { %v288_v10 = vadd.f32 %v505_v9, %v480_v8  ;;  %v282_v11 = vpop.f32.mrb[1].mxu0 }
  0xf0   : > { %v283_v12 = vadd.f32 %v480_v8, %v282_v11 }
  0xf1   : > { %v292_v14 = vmax.f32 %v288_v10, 0.0 }
  0xf2   : > { %v291_v15 = vmax.f32 %v283_v12, 0.0 }
  0xf3   : > { %v301_v18 = vmul.f32 %v483_v13, %v292_v14 }
  0xf4   : > { %v300_v16 = vmul.f32 %v483_v13, %v291_v15 }
  0xf5   : > { %v306_v19 = vsel %vm302_vm1, %v301_v18, 0.0 }
  0xf6   : > { %v303_v17 = vsel %vm302_vm1, %v300_v16, 0.0 }
  0xf7   : > { %304 = vadd.xlane.f32.xlu0 %v303_v17 }
  0xfb   : > { %307 = vadd.xlane.f32.xlu0 %v306_v19 }
 0x184   : > { %v305_v23 = vpop.xlane.xlu0 %304 }
 0x185   : > { %v316_v26 = vrot.slane %v305_v23, %v315_v24 }
 0x188   : > { %v308_v25 = vpop.xlane.xlu0 %307 }
 0x189   : > { %v320_v27 = vrot.slane %v308_v25, %v315_v24 }
 0x18b   : > { %v322_v28 = vsel %vm321_vm2, %v320_v27, %v316_v26 }
 0x18c   : > { %v325_v29 = vsel %vm324_vm3, %v322_v28, -inf }
 0x18d   : > { %326 = vmax.xlane.f32.xlu1 %v325_v29 }
 0x21a   : > { %v327_v33 = vpop.xlane.xlu1 %326 }
 0x21b   : > { %v332_v34 = vrot.slane %v327_v33, %v331_v31  ;;  %v336_v35 = vrot.slane %v327_v33, %v335_v32 }
 0x21d   : > { %v339_v36 = vsub.f32 %v305_v23, %v332_v34  ;;  %v340_v37 = vsub.f32 %v308_v25, %v336_v35 }
 0x21f   : > { %v341_v38 = vmul.f32 1.442695, %v339_v36  ;;  %v343_v39 = vmul.f32 1.442695, %v340_v37 }
 0x221   : > { %556 = vpow2.f32 %v341_v38 }
 0x222   : > { %558 = vpow2.f32 %v343_v39 }
 0x22b   : > { %v557_v40 = vpop.eup %556 }
 0x22c   : > { %v559_v41 = vpop.eup %558  ;;  %348 = vperm.xlu1 %554, %v557_v40  }
 0x22d   : > { %351 = vperm.xlu0 %555, %v559_v41  }
 0x2ab   : > { %v349_v42 = vpop.permute.xlu1 %348 }
 0x2ac   : > { %v352_v43 = vpop.permute.xlu0 %351  ;;  %v356_v44 = vrot.slane %v349_v42, %v315_v24 }
 0x2ad   : > { %v360_v45 = vrot.slane %v352_v43, %v315_v24 }
 0x2af   : > { %v361_v46 = vsel %vm321_vm2, %v360_v45, %v356_v44 }
 0x2b0   : > { %v363_v47 = vsel %vm324_vm3, %v361_v46, 0.0 }
 0x2b1   : > { %364 = vadd.xlane.f32.xlu1 %v363_v47 }
 0x33e   : > { %v365_v48 = vpop.xlane.xlu1 %364 }
 0x33f   : > { %v370_v49 = vrot.slane %v365_v48, %v331_v31  ;;  %v374_v50 = vrot.slane %v365_v48, %v335_v32 }
 0x341   : > { %560 = vrcp.f32 %v370_v49 }
 0x342   : > { %562 = vrcp.f32 %v374_v50 }
 0x34b   : > { %v561_v51 = vpop.eup %560 }
 0x34c   : > { %v378_v52 = vmul.f32 %v561_v51, %v557_v40  ;;  %v563_v53 = vpop.eup %562 }
 0x34d   : > { %v380_v54 = vmul.f32 %v563_v53, %v559_v41 }
 0x34e   : > { %384 = vperm.xlu0 %555, %v378_v52  }
 0x352   : > { %387 = vperm.xlu0 %555, %v380_v54  }
 0x3cd   : > { %v385_v55 = vpop.permute.xlu0 %384 }
 0x3ce   : > { %v392_v57 = vrot.slane %v385_v55, %v315_v24 }
 0x3d1   : > { %v388_v56 = vpop.permute.xlu0 %387 }
 0x3d2   : > { %v396_v58 = vrot.slane %v388_v56, %v315_v24 }
 0x3d4   : > { %v397_v59 = vsel %vm321_vm2, %v396_v58, %v392_v57 }
 0x3d5   : > { %399 = vst.msk [vmem:[%s190_s30] sm:$0x3] %vm324_vm3, %v397_v59 }
 0x3d6   : > { %577 = shalt.err (!%p574_p3)
}
 0x3d7   : > { %s578_s13 = scalar_lea.hbm %s735_s8, 32  ;;  %s582_s22 = scalar_lea.hbm %s783_s4, 64 }
 0x3d8   : > { %p579_p4 = scmp.ne.s32.totalorder %s735_s8, %s578_s13  ;;  %p583_p9 = scmp.lt.u32.totalorder %s735_s8, %s783_s4 }
 0x3d9   : > { %p584_p10 = scmp.lt.u32.totalorder %s582_s22, %s578_s13  ;;  %p586_p12 = scmp.lt.u32.totalorder %s578_s13, %s735_s8 }
 0x3da   : > { %p580_p7 = pnand %p579_p4, %p693_p5 }
 0x3db   : > { %p585_p11 = por %p584_p10, %p583_p9 }
 0x3dc   : > { %p581_p8 = pneg %p580_p7 }
 0x3dd   : > { %p587_p13 = por %p586_p12, %p585_p11 }
 0x3df   : > { %p588_p0 = pnand %p587_p13, %p581_p8 }
 0x3e1   : > { %591 = shalt.err (!%p588_p0)
}
 0x3e2   : > { %514 = dma.vmem_to_hbm [thread:$0]  (%p693_p5), %s737_s5, 32, %s735_s8, %s401_s19  }
 0x3e3 PF: > { %p520_p1 = scmp.ge.s32.totalorder %s626_s18, 2  ;;  %s426_s28 = sand.u32 1, %s614_s15  }
 0x3e4   : > { %s427_s29 = scalar_lea.sflag [#allocation3], %s426_s28 }
 0x3e5   : > { %p517_p2 = pnand %p520_p1, %p697_p6 }
 0x3e7   : > { %609 = dma.done.wait (!%p517_p2), %s427_s29, 32  }
 0x3e8   : > { %611 = vsyncadd (!%p517_p2), %s427_s29, 4294967264  ;;  %p14_p3 = scmp.ge.s32.totalorder %s680_s21, 4   ;;  %s786_s15 = smov %s618_s16 }
 0x3e9   : > { %s787_s16 = smov %s622_s17  ;;  %s788_s17 = smov %s691_s24 }
 0x3ea   : > { %s789_s18 = smov %s680_s21  ;;  %16 = sbr.rel (!%p14_p3) target bundleno = 3 (0x3), region = 71 }
 0x3f1   :  { %432 = vsyncpa [#allocation3], 1 }
 0x3f2   :  { %434 = vsyncpa [#allocation3 + $0x1], 1 }

</bundles_post_ra>
